<compile_context>
chip_gen: v7x
topology: tpu7x:2x2x1
jax: 0.10.0
libtpu: 0.0.40
codegen_flags: <defaults>
</compile_context>

<pallas_src>
import functools

import jax
import jax.numpy as jnp
from jax.experimental import pallas as pl
from jax.experimental.pallas import tpu as pltpu

LANE = 128


def _round_up(n, m):
    return ((n + m - 1) // m) * m


def policy_kernel(x_ref, w1_ref, b1_ref, w2_ref, b2_ref, w3_ref, b3_ref,
                  logp_ref):
    # x arrives bf16 (MXU-native); all accumulation / elementwise math is f32.
    x = x_ref[...]

    h1 = jnp.tanh(
        jnp.dot(x, w1_ref[...], preferred_element_type=jnp.float32)
        + b1_ref[...]
    )
    h2 = jnp.tanh(
        jnp.dot(h1.astype(jnp.bfloat16), w2_ref[...],
                preferred_element_type=jnp.float32)
        + b2_ref[...]
    )
    # b3 carries -1e30 on the padded action lanes (W3's padded columns are
    # zero), so no explicit masking is needed before the softmax.
    logits = (
        jnp.dot(h2.astype(jnp.bfloat16), w3_ref[...],
                preferred_element_type=jnp.float32)
        + b3_ref[...]
    )

    # Numerically-stable log-softmax over the action axis (f32).
    m = jnp.max(logits, axis=-1, keepdims=True)
    shifted = logits - m
    s = jnp.sum(jnp.exp(shifted), axis=-1, keepdims=True)
    logp_ref[...] = shifted - jnp.log(s)


def init_params(key, dim_state, dim_action, dim_hidden=128):
    """PyTorch-Linear-style init (+-1/sqrt(fan_in)).

    W1 keeps its true contraction dim (dim_state, unpadded); hidden/action
    output dims are zero-padded to the 128-lane width.  Weights are stored
    bf16 (MXU-native, halves weight DMA/VMEM); biases f32.  b3's padded
    action lanes are set to -1e30 so they drop out of the softmax for free.
    """
    h_pad = _round_up(dim_hidden, LANE)
    a_pad = _round_up(dim_action, LANE)
    ks = jax.random.split(key, 6)

    def lin(kw, kb, fan_in, fan_out, in_pad, out_pad, pad_bias_value=0.0):
        bound = 1.0 / float(fan_in) ** 0.5
        w = jax.random.uniform(kw, (fan_in, fan_out), jnp.float32, -bound, bound)
        b = jax.random.uniform(kb, (1, fan_out), jnp.float32, -bound, bound)
        w_p = jnp.zeros((in_pad, out_pad), jnp.float32).at[:fan_in, :fan_out].set(w)
        b_p = jnp.full((1, out_pad), pad_bias_value, jnp.float32).at[:, :fan_out].set(b)
        return w_p.astype(jnp.bfloat16), b_p

    w1, b1 = lin(ks[0], ks[1], dim_state, dim_hidden, dim_state, h_pad)
    w2, b2 = lin(ks[2], ks[3], dim_hidden, dim_hidden, h_pad, h_pad)
    w3, b3 = lin(ks[4], ks[5], dim_hidden, dim_action, h_pad, a_pad,
                 pad_bias_value=-1e30)
    return dict(w1=w1, b1=b1, w2=w2, b2=b2, w3=w3, b3=b3,
                dim_state=dim_state, dim_action=dim_action,
                dim_hidden=dim_hidden)


def policy_forward(x, params, *, block_batch=2048):
    """x: [B, dim_state] float32.  Returns (probs, log_probs), each [B, dim_action]."""
    w1, b1, w2, b2, w3, b3 = (params[k] for k in ("w1", "b1", "w2", "b2", "w3", "b3"))
    dim_action = params["dim_action"]
    B, dim_state = x.shape
    h_pad = w1.shape[1]
    a_pad = w3.shape[1]

    # Batch padded only to the sublane width; bf16 cast fused with the pad.
    b_pad = _round_up(B, 8)
    x_b = x.astype(jnp.bfloat16)
    if b_pad != B:
        x_b = jnp.zeros((b_pad, dim_state), jnp.bfloat16).at[:B].set(x_b)

    # Batch tile: multiple of 8, ~1 MiB output blocks, and capped so the grid
    # has >= 2 steps whenever the batch allows (megacore on v7x).
    tb = min(_round_up(block_batch, 8), _round_up(pl.cdiv(b_pad, 2), 8))
    grid = (pl.cdiv(b_pad, tb),)   # ragged last block handled by Pallas

    resident = lambda shape: pl.BlockSpec(shape, lambda i: (0, 0))  # stays in VMEM

    logp_p = pl.pallas_call(
        policy_kernel,
        out_shape=jax.ShapeDtypeStruct((b_pad, a_pad), jnp.float32),
        grid=grid,
        in_specs=[
            pl.BlockSpec((tb, dim_state), lambda i: (i, 0)),     # x: tiled over batch
            resident((dim_state, h_pad)), resident((1, h_pad)),  # W1, b1
            resident((h_pad, h_pad)), resident((1, h_pad)),      # W2, b2
            resident((h_pad, a_pad)), resident((1, a_pad)),      # W3, b3
        ],
        out_specs=pl.BlockSpec((tb, a_pad), lambda i: (i, 0)),   # logp (lane-dense)
        compiler_params=pltpu.CompilerParams(
            dimension_semantics=("parallel",),                   # megacore on v7x
            vmem_limit_bytes=32 * 1024 * 1024,
        ),
    )(x_b, w1, b1, w2, b2, w3, b3)

    log_probs = logp_p[:B, :dim_action]
    probs = jnp.exp(log_probs)   # exact wrt log_probs; negligible XLA work
    return probs, log_probs


def _reference_forward(x, params):
    """Pure-JAX reference with the same bf16-matmul / f32-softmax recipe."""
    w1, b1, w2, b2, w3, b3 = (params[k] for k in ("w1", "b1", "w2", "b2", "w3", "b3"))
    dim_action = params["dim_action"]
    h1 = jnp.tanh(jnp.dot(x.astype(jnp.bfloat16), w1,
                          preferred_element_type=jnp.float32) + b1)
    h2 = jnp.tanh(jnp.dot(h1.astype(jnp.bfloat16), w2,
                          preferred_element_type=jnp.float32) + b2)
    logits = (jnp.dot(h2.astype(jnp.bfloat16), w3,
                      preferred_element_type=jnp.float32) + b3)[:, :dim_action]
    return jax.nn.softmax(logits, axis=-1), jax.nn.log_softmax(logits, axis=-1)


if __name__ == "__main__":
    key = jax.random.PRNGKey(0)
    k_x, k_p = jax.random.split(key)

    # Module-consistent small shapes (dim_hidden=128 is the BasePolicy default).
    B, dim_state, dim_action, dim_hidden = 8, 16, 4, 128
    x = jax.random.normal(k_x, (B, dim_state), jnp.float32)
    params = init_params(k_p, dim_state, dim_action, dim_hidden)

    probs, log_probs = jax.block_until_ready(policy_forward(x, params))
    probs_ref, logp_ref = _reference_forward(x, params)

    # sanity: shapes, exactly-normalized probs (probs == exp(logp) by
    # construction), and agreement with the pure-JAX reference.
    assert probs.shape == (B, dim_action)
    assert log_probs.shape == (B, dim_action)
    assert jnp.allclose(jnp.sum(probs, axis=-1), 1.0, atol=1e-5)
    assert jnp.allclose(jnp.exp(log_probs), probs, atol=1e-6)
    assert jnp.allclose(probs, probs_ref, atol=2e-2)
    assert jnp.allclose(log_probs, logp_ref, atol=2e-2)

    print("KERNEL_OK")
</pallas_src>

<mosaic_0001>
module attributes {stable_mosaic.version = 11 : i64} {
  func.func @policy_kernel(%arg0: i32, %arg1: memref<8x16xbf16, #tpu.memory_space<vmem>>, %arg2: memref<16x128xbf16, #tpu.memory_space<vmem>>, %arg3: memref<1x128xf32, #tpu.memory_space<vmem>>, %arg4: memref<128x128xbf16, #tpu.memory_space<vmem>>, %arg5: memref<1x128xf32, #tpu.memory_space<vmem>>, %arg6: memref<128x128xbf16, #tpu.memory_space<vmem>>, %arg7: memref<1x128xf32, #tpu.memory_space<vmem>>, %arg8: memref<8x128xf32, #tpu.memory_space<vmem>>) attributes {dimension_semantics = [#tpu.dimension_semantics<parallel>], iteration_bounds = array<i64: 1>, scalar_prefetch = 0 : i64, scratch_operands = 0 : i64, tpu.core_type = #tpu.core_type<tc>, window_params = [{transform_indices = @transform_0, window_bounds = array<i64: 8, 16>}, {pipeline_mode = #tpu.pipeline_mode<synchronous>, transform_indices = @transform_1, window_bounds = array<i64: 16, 128>}, {pipeline_mode = #tpu.pipeline_mode<synchronous>, transform_indices = @transform_2, window_bounds = array<i64: 1, 128>}, {pipeline_mode = #tpu.pipeline_mode<synchronous>, transform_indices = @transform_3, window_bounds = array<i64: 128, 128>}, {pipeline_mode = #tpu.pipeline_mode<synchronous>, transform_indices = @transform_4, window_bounds = array<i64: 1, 128>}, {pipeline_mode = #tpu.pipeline_mode<synchronous>, transform_indices = @transform_5, window_bounds = array<i64: 128, 128>}, {pipeline_mode = #tpu.pipeline_mode<synchronous>, transform_indices = @transform_6, window_bounds = array<i64: 1, 128>}, {transform_indices = @transform_7, window_bounds = array<i64: 8, 128>}]} {
    %c0 = arith.constant 0 : index
    %c0_0 = arith.constant 0 : index
    %0 = vector.load %arg1[%c0, %c0_0] : memref<8x16xbf16, #tpu.memory_space<vmem>>, vector<8x16xbf16>
    %c0_1 = arith.constant 0 : index
    %c0_2 = arith.constant 0 : index
    %1 = vector.load %arg2[%c0_1, %c0_2] : memref<16x128xbf16, #tpu.memory_space<vmem>>, vector<16x128xbf16>
    %cst = arith.constant dense<0.000000e+00> : vector<8x128xf32>
    %2 = tpu.matmul %0, %1, %cst {dimension_numbers = #tpu.dot_dimension_numbers<[1], [0], [0], [1], [0, 0, 1, 1], [], []>} : vector<8x16xbf16>, vector<16x128xbf16>, vector<8x128xf32> -> vector<8x128xf32>
    %c0_3 = arith.constant 0 : index
    %c0_4 = arith.constant 0 : index
    %3 = vector.load %arg3[%c0_3, %c0_4] : memref<1x128xf32, #tpu.memory_space<vmem>>, vector<1x128xf32>
    %4 = vector.broadcast %3 : vector<1x128xf32> to vector<8x128xf32>
    %5 = arith.addf %2, %4 : vector<8x128xf32>
    %6 = math.tanh %5 : vector<8x128xf32>
    %7 = arith.truncf %6 : vector<8x128xf32> to vector<8x128xbf16>
    %c0_5 = arith.constant 0 : index
    %c0_6 = arith.constant 0 : index
    %8 = vector.load %arg4[%c0_5, %c0_6] : memref<128x128xbf16, #tpu.memory_space<vmem>>, vector<128x128xbf16>
    %cst_7 = arith.constant dense<0.000000e+00> : vector<8x128xf32>
    %9 = tpu.matmul %7, %8, %cst_7 {dimension_numbers = #tpu.dot_dimension_numbers<[1], [0], [0], [1], [0, 0, 1, 1], [], []>} : vector<8x128xbf16>, vector<128x128xbf16>, vector<8x128xf32> -> vector<8x128xf32>
    %c0_8 = arith.constant 0 : index
    %c0_9 = arith.constant 0 : index
    %10 = vector.load %arg5[%c0_8, %c0_9] : memref<1x128xf32, #tpu.memory_space<vmem>>, vector<1x128xf32>
    %11 = vector.broadcast %10 : vector<1x128xf32> to vector<8x128xf32>
    %12 = arith.addf %9, %11 : vector<8x128xf32>
    %13 = math.tanh %12 : vector<8x128xf32>
    %14 = arith.truncf %13 : vector<8x128xf32> to vector<8x128xbf16>
    %c0_10 = arith.constant 0 : index
    %c0_11 = arith.constant 0 : index
    %15 = vector.load %arg6[%c0_10, %c0_11] : memref<128x128xbf16, #tpu.memory_space<vmem>>, vector<128x128xbf16>
    %cst_12 = arith.constant dense<0.000000e+00> : vector<8x128xf32>
    %16 = tpu.matmul %14, %15, %cst_12 {dimension_numbers = #tpu.dot_dimension_numbers<[1], [0], [0], [1], [0, 0, 1, 1], [], []>} : vector<8x128xbf16>, vector<128x128xbf16>, vector<8x128xf32> -> vector<8x128xf32>
    %c0_13 = arith.constant 0 : index
    %c0_14 = arith.constant 0 : index
    %17 = vector.load %arg7[%c0_13, %c0_14] : memref<1x128xf32, #tpu.memory_space<vmem>>, vector<1x128xf32>
    %18 = vector.broadcast %17 : vector<1x128xf32> to vector<8x128xf32>
    %19 = arith.addf %16, %18 : vector<8x128xf32>
    %cst_15 = arith.constant dense<0xFF800000> : vector<8xf32>
    %20 = vector.multi_reduction <maximumf>, %19, %cst_15 [1] : vector<8x128xf32> to vector<8xf32>
    %21 = vector.shape_cast %20 : vector<8xf32> to vector<8x1xf32>
    %22 = vector.broadcast %21 : vector<8x1xf32> to vector<8x128xf32>
    %23 = arith.subf %19, %22 : vector<8x128xf32>
    %24 = math.exp %23 : vector<8x128xf32>
    %cst_16 = arith.constant dense<0.000000e+00> : vector<8xf32>
    %25 = vector.multi_reduction <add>, %24, %cst_16 [1] : vector<8x128xf32> to vector<8xf32>
    %26 = vector.shape_cast %25 : vector<8xf32> to vector<8x1xf32>
    %27 = math.log %26 : vector<8x1xf32>
    %28 = vector.broadcast %27 : vector<8x1xf32> to vector<8x128xf32>
    %29 = arith.subf %23, %28 : vector<8x128xf32>
    %c0_17 = arith.constant 0 : index
    %c0_18 = arith.constant 0 : index
    %30 = vector.load %arg8[%c0_17, %c0_18] : memref<8x128xf32, #tpu.memory_space<vmem>>, vector<8x128xf32>
    tpu.vector_store %arg8[%c0_17, %c0_18], %29 {strides = array<i32>} : memref<8x128xf32, #tpu.memory_space<vmem>>, vector<8x128xf32>,
    return
  }
  func.func @transform_0(%arg0: i32) -> (i32, i32) {
    %c0_i32 = arith.constant 0 : i32
    %c0_i32_0 = arith.constant 0 : i32
    return %arg0, %c0_i32 : i32, i32
  }
  func.func @transform_1(%arg0: i32) -> (i32, i32) {
    %c0_i32 = arith.constant 0 : i32
    %c0_i32_0 = arith.constant 0 : i32
    %c0_i32_1 = arith.constant 0 : i32
    return %c0_i32, %c0_i32_0 : i32, i32
  }
  func.func @transform_2(%arg0: i32) -> (i32, i32) {
    %c0_i32 = arith.constant 0 : i32
    %c0_i32_0 = arith.constant 0 : i32
    %c0_i32_1 = arith.constant 0 : i32
    return %c0_i32, %c0_i32_0 : i32, i32
  }
  func.func @transform_3(%arg0: i32) -> (i32, i32) {
    %c0_i32 = arith.constant 0 : i32
    %c0_i32_0 = arith.constant 0 : i32
    %c0_i32_1 = arith.constant 0 : i32
    return %c0_i32, %c0_i32_0 : i32, i32
  }
  func.func @transform_4(%arg0: i32) -> (i32, i32) {
    %c0_i32 = arith.constant 0 : i32
    %c0_i32_0 = arith.constant 0 : i32
    %c0_i32_1 = arith.constant 0 : i32
    return %c0_i32, %c0_i32_0 : i32, i32
  }
  func.func @transform_5(%arg0: i32) -> (i32, i32) {
    %c0_i32 = arith.constant 0 : i32
    %c0_i32_0 = arith.constant 0 : i32
    %c0_i32_1 = arith.constant 0 : i32
    return %c0_i32, %c0_i32_0 : i32, i32
  }
  func.func @transform_6(%arg0: i32) -> (i32, i32) {
    %c0_i32 = arith.constant 0 : i32
    %c0_i32_0 = arith.constant 0 : i32
    %c0_i32_1 = arith.constant 0 : i32
    return %c0_i32, %c0_i32_0 : i32, i32
  }
  func.func @transform_7(%arg0: i32) -> (i32, i32) {
    %c0_i32 = arith.constant 0 : i32
    %c0_i32_0 = arith.constant 0 : i32
    return %arg0, %c0_i32 : i32, i32
  }
}

</mosaic_0001>

<bundles_post_ra>
// kernel: tpu_custom_call.1
= control target key start
LH: loop header
LB: loop body
LE: loop exit
PB: predicated region body
PF: predicated region fallthrough
CT: control target
= control target key end

     0   :  { %12 = vsyncpa [#allocation3], 0  ;;  %s781_s0 = inlined_call_operand.hbm [shape: bf16[8,16], index: 0, kind: input, shape index: {}]   ;;  %s782_s1 = inlined_call_operand.hbm [shape: bf16[16,128], index: 1, kind: input, shape index: {}]   ;;  %s783_s2 = inlined_call_operand.vmem [shape: f32[1,128], index: 2, kind: input, shape index: {}]   ;;  %s784_s3 = inlined_call_operand.hbm [shape: bf16[128,128], index: 3, kind: input, shape index: {}]   ;;  %s785_s4 = inlined_call_operand.vmem [shape: f32[1,128], index: 4, kind: input, shape index: {}]   ;;  %s786_s5 = inlined_call_operand.hbm [shape: bf16[128,128], index: 5, kind: input, shape index: {}]   ;;  %s787_s6 = inlined_call_operand.vmem [shape: f32[1,128], index: 6, kind: input, shape index: {}]   ;;  %s788_s7 = inlined_call_operand.hbm [shape: f32[8,128], index: 7, kind: output, shape index: {}]  }
   0x1   :  { %13 = vsyncpa [#allocation6], 0 }
   0x2   :  { %14 = vsyncpa [#allocation9], 0 }
   0x3   :  { %15 = vsyncpa [#allocation4], 0  ;;  %s634_s24 = smov [#allocation5]   ;;  %s516_s28 = scalar_lea.hbm %s782_s1, 128 }
   0x4   :  { %s31_s25 = sshll.u32 %s634_s24, 4  ;;  %p517_p0 = scmp.ne.s32.totalorder %s782_s1, %s516_s28  ;;  %s32_s25 = int_to_ptr.vmem [resolvable:$true] %s31_s25 }
   0x5   :  { %p520_p1 = scmp.lt.u32.totalorder %s516_s28, %s782_s1 }
   0x7   :  { %p522_p2 = pnand %p520_p1, %p517_p0 }
   0x9   :  { %525 = shalt.err (!%p522_p2)
}
   0xa   :  { %s526_s10 = scalar_lea.vmem %s32_s25, 128  ;;  %p531_p4 = scmp.lt.s32.totalorder %s32_s25, %s32_s25 }
   0xb   :  { %p527_p3 = scmp.ne.s32.totalorder %s32_s25, %s526_s10  ;;  %p532_p5 = scmp.lt.s32.totalorder %s526_s10, %s526_s10 }
   0xd   :  { %p533_p6 = por %p532_p5, %p531_p4 }
   0xf   :  { %p534_p7 = pnand %p533_p6, %p527_p3 }
  0x11   :  { %537 = shalt.err (!%p534_p7)
}
  0x12   :  { %s635_s11 = smov 64   ;;  %s636_s12 = smov 4  }
  0x13   :  { %37 = dma.hbm_to_vmem [thread:$0]  %s782_s1, 128, %s32_s25, [#allocation6], %s635_s11, %s635_s11, %s636_s12  }
  0x14   :  { %s637_s15 = smov [#allocation2]   ;;  %s638_s17 = smov [#allocation7]  }
  0x15   :  { %s22_s16 = sshll.u32 %s637_s15, 4  ;;  %s45_s18 = sshll.u32 %s638_s17, 4  ;;  %s23_s16 = int_to_ptr.vmem [resolvable:$true] %s22_s16  ;;  %s46_s18 = int_to_ptr.vmem [resolvable:$true] %s45_s18 }
  0x16   :  { %s538_s21 = scalar_lea.hbm %s781_s0, 64 }
  0x17   :  { %p539_p8 = scmp.ne.s32.totalorder %s781_s0, %s538_s21  ;;  %p542_p9 = scmp.lt.u32.totalorder %s538_s21, %s781_s0 }
  0x19   :  { %p544_p10 = pnand %p542_p9, %p539_p8 }
  0x1b   :  { %547 = shalt.err (!%p544_p10)
}
  0x1c   :  { %s548_s1 = scalar_lea.vmem %s23_s16, 64  ;;  %p553_p12 = scmp.lt.s32.totalorder %s23_s16, %s23_s16 }
  0x1d   :  { %p549_p11 = scmp.ne.s32.totalorder %s23_s16, %s548_s1  ;;  %p554_p13 = scmp.lt.s32.totalorder %s548_s1, %s548_s1 }
  0x1f   :  { %p555_p0 = por %p554_p13, %p553_p12 }
  0x21   :  { %p556_p1 = pnand %p555_p0, %p549_p11 }
  0x23   :  { %559 = shalt.err (!%p556_p1)
}
  0x24   :  { %25 = dma.hbm_to_vmem [thread:$0]  %s781_s0, 64, %s23_s16, [#allocation3]  }
  0x25   :  { %s560_s30 = scalar_lea.hbm %s784_s3, 1024 }
  0x26   :  { %p561_p2 = scmp.ne.s32.totalorder %s784_s3, %s560_s30  ;;  %p564_p3 = scmp.lt.u32.totalorder %s560_s30, %s784_s3 }
  0x28   :  { %p566_p4 = pnand %p564_p3, %p561_p2 }
  0x2a   :  { %569 = shalt.err (!%p566_p4)
}
  0x2b   :  { %s570_s14 = scalar_lea.vmem %s46_s18, 1024  ;;  %p575_p6 = scmp.lt.s32.totalorder %s46_s18, %s46_s18 }
  0x2c   :  { %p571_p5 = scmp.ne.s32.totalorder %s46_s18, %s570_s14  ;;  %p576_p7 = scmp.lt.s32.totalorder %s570_s14, %s570_s14 }
  0x2e   :  { %p577_p8 = por %p576_p7, %p575_p6 }
  0x30   :  { %p578_p9 = pnand %p577_p8, %p571_p5 }
  0x32   :  { %581 = shalt.err (!%p578_p9)
}
  0x33   :  { %51 = dma.hbm_to_vmem [thread:$0]  %s784_s3, 1024, %s46_s18, [#allocation6], %s635_s11, %s635_s11, %s636_s12  }
  0x34   :  { %s639_s16 = smov [#allocation8]   ;;  %s582_s21 = scalar_lea.hbm %s786_s5, 1024 }
  0x35   :  { %s59_s17 = sshll.u32 %s639_s16, 4  ;;  %p583_p10 = scmp.ne.s32.totalorder %s786_s5, %s582_s21  ;;  %s60_s17 = int_to_ptr.vmem [resolvable:$true] %s59_s17 }
  0x36   :  { %p586_p11 = scmp.lt.u32.totalorder %s582_s21, %s786_s5 }
  0x38   :  { %p588_p12 = pnand %p586_p11, %p583_p10 }
  0x3a   :  { %591 = shalt.err (!%p588_p12)
}
  0x3b   :  { %s592_s1 = scalar_lea.vmem %s60_s17, 1024  ;;  %p597_p0 = scmp.lt.s32.totalorder %s60_s17, %s60_s17 }
  0x3c   :  { %p593_p13 = scmp.ne.s32.totalorder %s60_s17, %s592_s1  ;;  %p598_p1 = scmp.lt.s32.totalorder %s592_s1, %s592_s1 }
  0x3e   :  { %p599_p2 = por %p598_p1, %p597_p0 }
  0x40   :  { %p600_p3 = pnand %p599_p2, %p593_p13 }
  0x42   :  { %603 = shalt.err (!%p600_p3)
}
  0x43   :  { %65 = dma.hbm_to_vmem [thread:$0]  %s786_s5, 1024, %s60_s17, [#allocation9], %s635_s11, %s635_s11, %s636_s12  }
  0x44   :  { %626 = dma.done.wait [#allocation3], 64  }
  0x45   :  { %627 = vsyncadd [#allocation3], 4294967232 }
  0x46   :  { %628 = dma.done.wait [#allocation6], 1152  }
  0x47   :  { %629 = vsyncadd [#allocation6], 4294966144 }
  0x48   :  { %630 = dma.done.wait [#allocation9], 1024  }
  0x49   :  { %631 = vsyncadd [#allocation9], 4294966272  ;;  %v640_v0 = vmov 0.0   ;;  %vm641_vm0 = vmmov 0   ;;  %v491_v1 = vld [vmem:[#allocation5] sm:$0xff]   ;;  %vm97_vm1 = vcmask 130048  }
  0x4a   :  { %436 = vmatprep.subr.bf16.mxu0 %v640_v0  ;;  %438 = vmatprep.mubr.msk.bf16.mxu0 %vm641_vm0, %v640_v0  ;;  %v81_v2 = vld [vmem:[#allocation2] sm:$0xf]  ;;  %v492_v3 = vld [vmem:[#allocation7] sm:$0xff]   ;;  %v493_v4 = vld [vmem:[#allocation7 + $0x8] sm:$0xff]  }
  0x4b   :  { %442 = vmatprep.subr.bf16.mxu1 %v640_v0  ;;  %458 = vmatprep.mubr.msk.bf16.mxu1 %vm641_vm0, %v640_v0  ;;  %v494_v5 = vld [vmem:[#allocation7 + $0x10] sm:$0xff]   ;;  %v495_v6 = vld [vmem:[#allocation7 + $0x18] sm:$0xff]   ;;  %v496_v7 = vld [vmem:[#allocation7 + $0x20] sm:$0xff]  }
  0x4c   :  { %437 = vmatpush3.bf16.msra.mxu0 %v491_v1  ;;  %443 = vmatpush3.bf16.msra.mxu1 %v492_v3  ;;  %v497_v8 = vld [vmem:[#allocation7 + $0x28] sm:$0xff]   ;;  %v498_v9 = vld [vmem:[#allocation7 + $0x30] sm:$0xff]   ;;  %v499_v10 = vld [vmem:[#allocation7 + $0x38] sm:$0xff]  }
  0x4d   :  { %462 = vmatprep.subr.bf16.mxu0 %v640_v0  ;;  %444 = vmatprep.subr.bf16.mxu1 %v640_v0  ;;  %v500_v11 = vld [vmem:[#allocation8] sm:$0xff]   ;;  %v501_v12 = vld [vmem:[#allocation8 + $0x8] sm:$0xff]   ;;  %v502_v13 = vld [vmem:[#allocation8 + $0x10] sm:$0xff]  }
  0x4e   :  { %v503_v14 = vld [vmem:[#allocation8 + $0x18] sm:$0xff]   ;;  %v395_v15 = vld [vmem:[%s783_s2] ss:$0 sm:$0xff]  ;;  %v504_v23 = vld [vmem:[#allocation8 + $0x20] sm:$0xff]  }
  0x4f   :  { %439 = vmatmul.mubr.msk.bf16.vlgmr.msra.gmra.mrb[0].mxu0 %vm97_vm1, %v81_v2  ;;  %v505_v24 = vld [vmem:[#allocation8 + $0x28] sm:$0xff]   ;;  %v506_v25 = vld [vmem:[#allocation8 + $0x30] sm:$0xff]   ;;  %v507_v26 = vld [vmem:[#allocation8 + $0x38] sm:$0xff]  }
  0x50   :  { %478 = vmatprep.mubr.msk.bf16.mxu0 %vm641_vm0, %v640_v0  ;;  %445 = vmatpush3.bf16.msra.mxu1 %v493_v4  ;;  %v398_v27 = vld [vmem:[%s785_s4] ss:$0 sm:$0xff]  ;;  %s642_s4 = smov [#allocation10]  }
  0x51   :  { %446 = vmatprep.subr.bf16.mxu1 %v640_v0  ;;  %463 = vmatpush3.bf16.msra.mxu0 %v500_v11  ;;  %v407_v35 = vld [vmem:[%s787_s6] ss:$0 sm:$0xff]  ;;  %s384_s28 = sshll.u32 %s642_s4, 4  ;;  %s385_s28 = int_to_ptr.vmem [resolvable:$true] %s384_s28 }
  0x52   :  { %464 = vmatprep.subr.bf16.mxu0 %v640_v0  ;;  %s604_s6 = scalar_lea.vmem %s385_s28, 128  ;;  %p609_p5 = scmp.lt.s32.totalorder %s385_s28, %s385_s28 }
  0x53   :  { %p605_p4 = scmp.ne.s32.totalorder %s385_s28, %s604_s6  ;;  %p610_p6 = scmp.lt.s32.totalorder %s604_s6, %s604_s6 }
  0x54   :  { %447 = vmatpush3.bf16.msra.mxu1 %v494_v5 }
  0x55   :  { %448 = vmatprep.subr.bf16.mxu1 %v640_v0  ;;  %465 = vmatpush3.bf16.msra.mxu0 %v501_v12  ;;  %p611_p7 = por %p610_p6, %p609_p5 }
  0x56   :  { %466 = vmatprep.subr.bf16.mxu0 %v640_v0 }
  0x57   :  { %p612_p8 = pnand %p611_p7, %p605_p4 }
  0x58   :  { %449 = vmatpush3.bf16.msra.mxu1 %v495_v6 }
  0x59   :  { %450 = vmatprep.subr.bf16.mxu1 %v640_v0  ;;  %467 = vmatpush3.bf16.msra.mxu0 %v502_v13 }
  0x5a   :  { %468 = vmatprep.subr.bf16.mxu0 %v640_v0 }
  0x5c   :  { %451 = vmatpush3.bf16.msra.mxu1 %v496_v7 }
  0x5d   :  { %452 = vmatprep.subr.bf16.mxu1 %v640_v0  ;;  %469 = vmatpush3.bf16.msra.mxu0 %v503_v14 }
  0x5e   :  { %470 = vmatprep.subr.bf16.mxu0 %v640_v0 }
  0x60   :  { %453 = vmatpush3.bf16.msra.mxu1 %v497_v8 }
  0x61   :  { %454 = vmatprep.subr.bf16.mxu1 %v640_v0  ;;  %471 = vmatpush3.bf16.msra.mxu0 %v504_v23 }
  0x62   :  { %472 = vmatprep.subr.bf16.mxu0 %v640_v0 }
  0x64   :  { %455 = vmatpush3.bf16.msra.mxu1 %v498_v9 }
  0x65   :  { %456 = vmatprep.subr.bf16.mxu1 %v640_v0  ;;  %473 = vmatpush3.bf16.msra.mxu0 %v505_v24 }
  0x66   :  { %474 = vmatprep.subr.bf16.mxu0 %v640_v0 }
  0x68   :  { %457 = vmatpush3.bf16.msra.mxu1 %v499_v10 }
  0x69   :  { %475 = vmatpush3.bf16.msra.mxu0 %v506_v25 }
  0x6a   :  { %476 = vmatprep.subr.bf16.mxu0 %v640_v0 }
  0x6d   :  { %477 = vmatpush3.bf16.msra.mxu0 %v507_v26 }
 0x122   :  { %v135_v16 = vpop.f32.mrb[0].mxu0 }
 0x123   :  { %v136_v17 = vadd.f32 %v395_v15, %v135_v16  ;;  %v440_v18 = vpop.f32.mrb[1].mxu0 }
 0x124   :  { %v138_v19 = vpop.f32.mrb[2].mxu0 }
 0x125   :  { %508 = vtanh.f32 %v136_v17  ;;  %v441_v20 = vpop.f32.mrb[3].mxu0 }
 0x12f   :  { %v509_v21 = vpop.eup %508 }
 0x130   :  { %v142_v22 = vpack.c.bf16 %v509_v21, %v509_v21 }
 0x132   :  { %459 = vmatmul.mubr.bf16.vlgmr.msra.gmra.mrb[0].mxu1 %v142_v22 }
 0x205   :  { %v248_v28 = vpop.f32.mrb[0].mxu1 }
 0x206   :  { %v249_v29 = vadd.f32 %v398_v27, %v248_v28  ;;  %v460_v30 = vpop.f32.mrb[1].mxu1 }
 0x207   :  { %v251_v31 = vpop.f32.mrb[2].mxu1 }
 0x208   :  { %510 = vtanh.f32 %v249_v29  ;;  %v461_v32 = vpop.f32.mrb[3].mxu1 }
 0x212   :  { %v511_v33 = vpop.eup %510 }
 0x213   :  { %v255_v34 = vpack.c.bf16 %v511_v33, %v511_v33 }
 0x215   :  { %479 = vmatmul.mubr.bf16.vlgmr.msra.gmra.mrb[4].mxu0 %v255_v34 }
 0x2e8   :  { %v361_v36 = vpop.f32.mrb[4].mxu0 }
 0x2e9   :  { %v362_v37 = vadd.f32 %v407_v35, %v361_v36  ;;  %v480_v38 = vpop.f32.mrb[5].mxu0 }
 0x2ea   :  { %v364_v39 = vpop.f32.mrb[6].mxu0 }
 0x2eb   :  { %367 = vmax.xlane.f32.xlu0 %v362_v37  ;;  %v481_v40 = vpop.f32.mrb[7].mxu0 }
 0x378   :  { %v368_v41 = vpop.xlane.xlu0 %367 }
 0x379   :  { %v369_v42 = vsub.f32 %v362_v37, %v368_v41 }
 0x37b   :  { %v370_v43 = vmul.f32 1.442695, %v369_v42 }
 0x37d   :  { %512 = vpow2.f32 %v370_v43 }
 0x387   :  { %v513_v44 = vpop.eup %512 }
 0x388   :  { %372 = vadd.xlane.f32.xlu0 %v513_v44 }
 0x415   :  { %v373_v45 = vpop.xlane.xlu0 %372 }
 0x416   :  { %514 = vlog2.f32 %v373_v45 }
 0x420   :  { %v515_v46 = vpop.eup %514 }
 0x421   :  { %v375_v47 = vmul.f32 0.6931472, %v515_v46 }
 0x423   :  { %v376_v48 = vsub.f32 %v369_v42, %v375_v47 }
 0x425   :  { %377 = vst [vmem:[#allocation10] sm:$0xff] %v376_v48 }
 0x426   :  { %615 = shalt.err (!%p612_p8)
}
 0x427   :  { %s616_s8 = scalar_lea.hbm %s788_s7, 128 }
 0x428   :  { %p617_p9 = scmp.ne.s32.totalorder %s788_s7, %s616_s8  ;;  %p620_p10 = scmp.lt.u32.totalorder %s616_s8, %s788_s7 }
 0x42a   :  { %p622_p11 = pnand %p620_p10, %p617_p9 }
 0x42c   :  { %625 = shalt.err (!%p622_p11)
}
 0x42d   :  { %387 = dma.vmem_to_hbm [thread:$0]  %s385_s28, 128, %s788_s7, [#allocation4]  }
 0x42e   :  { %632 = dma.done.wait [#allocation4], 128  }
 0x42f   :  { %633 = vsyncadd [#allocation4], 4294967168 }
 0x430   :  { %391 = vsyncpa [#allocation3], 1 }
 0x431   :  { %392 = vsyncpa [#allocation6], 1 }
 0x432   :  { %393 = vsyncpa [#allocation9], 1 }
 0x433   :  { %394 = vsyncpa [#allocation4], 1 }

</bundles_post_ra>
